<compile_context>
chip_gen: v6e
topology: v6e:2x2x1
jax: 0.10.0
libtpu: 0.0.40
codegen_flags: <defaults>
</compile_context>

<pallas_src>
import jax
import jax.numpy as jnp
from jax.experimental import pallas as pl
from jax.experimental.pallas import tpu as pltpu


def encoder_kernel(x_ref, w1_ref, b1_ref, w2_ref, b2_ref, wmv_ref, bmv_ref,
                   out_ref):
    def leaky_relu(v):
        # max(v, 0.2*v) == leaky_relu(v, slope=0.2): single VPU max per element.
        return jnp.maximum(v, 0.2 * v)

    x = x_ref[...]

    h = leaky_relu(
        jnp.dot(x, w1_ref[...], preferred_element_type=jnp.float32) + b1_ref[...])
    h = leaky_relu(
        jnp.dot(h, w2_ref[...], preferred_element_type=jnp.float32) + b2_ref[...])

    # Fused mean|log_var head: one MXU push, one lane-denser output store.
    out_ref[...] = (
        jnp.dot(h, wmv_ref[...], preferred_element_type=jnp.float32) + bmv_ref[...]
    ).astype(out_ref.dtype)


def _round_up(n, m):
    return ((n + m - 1) // m) * m


def encoder_forward(x, params, *, block_b=512):
    """x: [B, input_dim] float32. params: dict of weights/biases.

    Weights are stored transposed relative to torch.nn.Linear ([in, out]) so
    the kernel computes x @ W + b directly on the MXU. Biases are [1, out].
    """
    B, input_dim = x.shape
    hidden_dim = params["w1"].shape[1]
    latent_dim = params["wm"].shape[1]

    # Fuse the two output heads (zero-cost concat in the wrapper).
    wmv = jnp.concatenate([params["wm"], params["wv"]], axis=1)  # [hid, 2*lat]
    bmv = jnp.concatenate([params["bm"], params["bv"]], axis=1)  # [1, 2*lat]

    # Batch tile: 256-multiple (block_b) for large B (fills v6e/v7x MXU rows);
    # for small B, round B up to a sublane multiple. Pad B so every grid step
    # sees a full tile (no reliance on tail-tile OOB padding semantics).
    tb = block_b if B >= block_b else _round_up(B, 8)
    b_pad = _round_up(B, tb)
    if b_pad != B:
        x = jnp.pad(x, ((0, b_pad - B), (0, 0)))

    grid = (b_pad // tb,)

    def resident(a):
        # Same block index every grid step -> stays in VMEM, no re-fetch.
        nd = a.ndim
        return pl.BlockSpec(a.shape, lambda i, _nd=nd: (0,) * _nd)

    in_specs = [
        pl.BlockSpec((tb, input_dim), lambda i: (i, 0)),  # x streamed over batch
        resident(params["w1"]), resident(params["b1"]),
        resident(params["w2"]), resident(params["b2"]),
        resident(wmv), resident(bmv),
    ]
    out_specs = pl.BlockSpec((tb, 2 * latent_dim), lambda i: (i, 0))

    flops = 2 * b_pad * (input_dim * hidden_dim
                         + hidden_dim * hidden_dim
                         + hidden_dim * 2 * latent_dim)
    bytes_accessed = 4 * (b_pad * input_dim
                          + input_dim * hidden_dim + hidden_dim
                          + hidden_dim * hidden_dim + hidden_dim
                          + hidden_dim * 2 * latent_dim + 2 * latent_dim
                          + b_pad * 2 * latent_dim)

    out = pl.pallas_call(
        encoder_kernel,
        grid=grid,
        in_specs=in_specs,
        out_specs=out_specs,
        out_shape=jax.ShapeDtypeStruct((b_pad, 2 * latent_dim), jnp.float32),
        compiler_params=pltpu.CompilerParams(
            dimension_semantics=("parallel",)),
        cost_estimate=pl.CostEstimate(
            flops=flops, transcendentals=0, bytes_accessed=bytes_accessed),
    )(x, params["w1"], params["b1"], params["w2"], params["b2"], wmv, bmv)

    out = out[:B]
    return out[:, :latent_dim], out[:, latent_dim:]


def init_params(key, input_dim, hidden_dim, latent_dim):
    """Deterministic init mirroring torch.nn.Linear's U(-1/sqrt(fan_in), +)."""
    def linear(k, fan_in, fan_out):
        kw, kb = jax.random.split(k)
        bound = 1.0 / jnp.sqrt(fan_in)
        w = jax.random.uniform(kw, (fan_in, fan_out), jnp.float32, -bound, bound)
        b = jax.random.uniform(kb, (1, fan_out), jnp.float32, -bound, bound)
        return w, b

    k1, k2, k3, k4 = jax.random.split(key, 4)
    w1, b1 = linear(k1, input_dim, hidden_dim)
    w2, b2 = linear(k2, hidden_dim, hidden_dim)
    wm, bm = linear(k3, hidden_dim, latent_dim)
    wv, bv = linear(k4, hidden_dim, latent_dim)
    return dict(w1=w1, b1=b1, w2=w2, b2=b2, wm=wm, bm=bm, wv=wv, bv=bv)


def _ref(x, p):
    lrelu = lambda v: jnp.where(v > 0, v, 0.2 * v)
    h = lrelu(x @ p["w1"] + p["b1"])
    h = lrelu(h @ p["w2"] + p["b2"])
    return h @ p["wm"] + p["bm"], h @ p["wv"] + p["bv"]


if __name__ == "__main__":
    key = jax.random.PRNGKey(0)
    k_param, k_x1, k_x2 = jax.random.split(key, 3)

    input_dim, hidden_dim, latent_dim = 32, 64, 16
    params = init_params(k_param, input_dim, hidden_dim, latent_dim)

    # Case 1: small batch, single full tile.
    x1 = jax.random.normal(k_x1, (8, input_dim), jnp.float32)
    mean1, lv1 = encoder_forward(x1, params)
    jax.block_until_ready((mean1, lv1))
    m_ref1, lv_ref1 = _ref(x1, params)
    assert jnp.allclose(mean1, m_ref1, atol=1e-5, rtol=1e-5)
    assert jnp.allclose(lv1, lv_ref1, atol=1e-5, rtol=1e-5)

    # Case 2: batch not a multiple of 8 -> exercises the zero-pad path.
    x2 = jax.random.normal(k_x2, (20, input_dim), jnp.float32)
    mean2, lv2 = encoder_forward(x2, params)
    jax.block_until_ready((mean2, lv2))
    m_ref2, lv_ref2 = _ref(x2, params)
    assert jnp.allclose(mean2, m_ref2, atol=1e-5, rtol=1e-5)
    assert jnp.allclose(lv2, lv_ref2, atol=1e-5, rtol=1e-5)

    print("KERNEL_OK")
</pallas_src>

<mosaic_0001>
module attributes {stable_mosaic.version = 11 : i64} {
  func.func @encoder_kernel(%arg0: i32, %arg1: memref<8x32xf32, #tpu.memory_space<vmem>>, %arg2: memref<32x64xf32, #tpu.memory_space<vmem>>, %arg3: memref<1x64xf32, #tpu.memory_space<vmem>>, %arg4: memref<64x64xf32, #tpu.memory_space<vmem>>, %arg5: memref<1x64xf32, #tpu.memory_space<vmem>>, %arg6: memref<64x32xf32, #tpu.memory_space<vmem>>, %arg7: memref<1x32xf32, #tpu.memory_space<vmem>>, %arg8: memref<8x32xf32, #tpu.memory_space<vmem>>) attributes {dimension_semantics = [#tpu.dimension_semantics<parallel>], iteration_bounds = array<i64: 1>, scalar_prefetch = 0 : i64, scratch_operands = 0 : i64, tpu.core_type = #tpu.core_type<tc>, window_params = [{transform_indices = @transform_0, window_bounds = array<i64: 8, 32>}, {pipeline_mode = #tpu.pipeline_mode<synchronous>, transform_indices = @transform_1, window_bounds = array<i64: 32, 64>}, {pipeline_mode = #tpu.pipeline_mode<synchronous>, transform_indices = @transform_2, window_bounds = array<i64: 1, 64>}, {pipeline_mode = #tpu.pipeline_mode<synchronous>, transform_indices = @transform_3, window_bounds = array<i64: 64, 64>}, {pipeline_mode = #tpu.pipeline_mode<synchronous>, transform_indices = @transform_4, window_bounds = array<i64: 1, 64>}, {pipeline_mode = #tpu.pipeline_mode<synchronous>, transform_indices = @transform_5, window_bounds = array<i64: 64, 32>}, {pipeline_mode = #tpu.pipeline_mode<synchronous>, transform_indices = @transform_6, window_bounds = array<i64: 1, 32>}, {transform_indices = @transform_7, window_bounds = array<i64: 8, 32>}]} {
    %c0 = arith.constant 0 : index
    %c0_0 = arith.constant 0 : index
    %0 = vector.load %arg1[%c0, %c0_0] : memref<8x32xf32, #tpu.memory_space<vmem>>, vector<8x32xf32>
    %c0_1 = arith.constant 0 : index
    %c0_2 = arith.constant 0 : index
    %1 = vector.load %arg2[%c0_1, %c0_2] : memref<32x64xf32, #tpu.memory_space<vmem>>, vector<32x64xf32>
    %cst = arith.constant dense<0.000000e+00> : vector<8x64xf32>
    %2 = tpu.matmul %0, %1, %cst {dimension_numbers = #tpu.dot_dimension_numbers<[1], [0], [0], [1], [0, 0, 1, 1], [], []>} : vector<8x32xf32>, vector<32x64xf32>, vector<8x64xf32> -> vector<8x64xf32>
    %c0_3 = arith.constant 0 : index
    %c0_4 = arith.constant 0 : index
    %3 = vector.load %arg3[%c0_3, %c0_4] : memref<1x64xf32, #tpu.memory_space<vmem>>, vector<1x64xf32>
    %4 = vector.broadcast %3 : vector<1x64xf32> to vector<8x64xf32>
    %5 = arith.addf %2, %4 : vector<8x64xf32>
    %cst_5 = arith.constant 2.000000e-01 : f32
    %6 = vector.broadcast %cst_5 : f32 to vector<8x64xf32>
    %7 = arith.mulf %6, %5 : vector<8x64xf32>
    %8 = arith.maximumf %5, %7 : vector<8x64xf32>
    %c0_6 = arith.constant 0 : index
    %c0_7 = arith.constant 0 : index
    %9 = vector.load %arg4[%c0_6, %c0_7] : memref<64x64xf32, #tpu.memory_space<vmem>>, vector<64x64xf32>
    %cst_8 = arith.constant dense<0.000000e+00> : vector<8x64xf32>
    %10 = tpu.matmul %8, %9, %cst_8 {dimension_numbers = #tpu.dot_dimension_numbers<[1], [0], [0], [1], [0, 0, 1, 1], [], []>} : vector<8x64xf32>, vector<64x64xf32>, vector<8x64xf32> -> vector<8x64xf32>
    %c0_9 = arith.constant 0 : index
    %c0_10 = arith.constant 0 : index
    %11 = vector.load %arg5[%c0_9, %c0_10] : memref<1x64xf32, #tpu.memory_space<vmem>>, vector<1x64xf32>
    %12 = vector.broadcast %11 : vector<1x64xf32> to vector<8x64xf32>
    %13 = arith.addf %10, %12 : vector<8x64xf32>
    %cst_11 = arith.constant 2.000000e-01 : f32
    %14 = vector.broadcast %cst_11 : f32 to vector<8x64xf32>
    %15 = arith.mulf %14, %13 : vector<8x64xf32>
    %16 = arith.maximumf %13, %15 : vector<8x64xf32>
    %c0_12 = arith.constant 0 : index
    %c0_13 = arith.constant 0 : index
    %17 = vector.load %arg6[%c0_12, %c0_13] : memref<64x32xf32, #tpu.memory_space<vmem>>, vector<64x32xf32>
    %cst_14 = arith.constant dense<0.000000e+00> : vector<8x32xf32>
    %18 = tpu.matmul %16, %17, %cst_14 {dimension_numbers = #tpu.dot_dimension_numbers<[1], [0], [0], [1], [0, 0, 1, 1], [], []>} : vector<8x64xf32>, vector<64x32xf32>, vector<8x32xf32> -> vector<8x32xf32>
    %c0_15 = arith.constant 0 : index
    %c0_16 = arith.constant 0 : index
    %19 = vector.load %arg7[%c0_15, %c0_16] : memref<1x32xf32, #tpu.memory_space<vmem>>, vector<1x32xf32>
    %20 = vector.broadcast %19 : vector<1x32xf32> to vector<8x32xf32>
    %21 = arith.addf %18, %20 : vector<8x32xf32>
    %c0_17 = arith.constant 0 : index
    %c0_18 = arith.constant 0 : index
    %22 = vector.load %arg8[%c0_17, %c0_18] : memref<8x32xf32, #tpu.memory_space<vmem>>, vector<8x32xf32>
    tpu.vector_store %arg8[%c0_17, %c0_18], %21 {strides = array<i32>} : memref<8x32xf32, #tpu.memory_space<vmem>>, vector<8x32xf32>,
    return
  }
  func.func @transform_0(%arg0: i32) -> (i32, i32) {
    %c0_i32 = arith.constant 0 : i32
    %c0_i32_0 = arith.constant 0 : i32
    return %arg0, %c0_i32 : i32, i32
  }
  func.func @transform_1(%arg0: i32) -> (i32, i32) {
    %c0_i32 = arith.constant 0 : i32
    %c0_i32_0 = arith.constant 0 : i32
    %c0_i32_1 = arith.constant 0 : i32
    return %c0_i32, %c0_i32_0 : i32, i32
  }
  func.func @transform_2(%arg0: i32) -> (i32, i32) {
    %c0_i32 = arith.constant 0 : i32
    %c0_i32_0 = arith.constant 0 : i32
    %c0_i32_1 = arith.constant 0 : i32
    return %c0_i32, %c0_i32_0 : i32, i32
  }
  func.func @transform_3(%arg0: i32) -> (i32, i32) {
    %c0_i32 = arith.constant 0 : i32
    %c0_i32_0 = arith.constant 0 : i32
    %c0_i32_1 = arith.constant 0 : i32
    return %c0_i32, %c0_i32_0 : i32, i32
  }
  func.func @transform_4(%arg0: i32) -> (i32, i32) {
    %c0_i32 = arith.constant 0 : i32
    %c0_i32_0 = arith.constant 0 : i32
    %c0_i32_1 = arith.constant 0 : i32
    return %c0_i32, %c0_i32_0 : i32, i32
  }
  func.func @transform_5(%arg0: i32) -> (i32, i32) {
    %c0_i32 = arith.constant 0 : i32
    %c0_i32_0 = arith.constant 0 : i32
    %c0_i32_1 = arith.constant 0 : i32
    return %c0_i32, %c0_i32_0 : i32, i32
  }
  func.func @transform_6(%arg0: i32) -> (i32, i32) {
    %c0_i32 = arith.constant 0 : i32
    %c0_i32_0 = arith.constant 0 : i32
    %c0_i32_1 = arith.constant 0 : i32
    return %c0_i32, %c0_i32_0 : i32, i32
  }
  func.func @transform_7(%arg0: i32) -> (i32, i32) {
    %c0_i32 = arith.constant 0 : i32
    %c0_i32_0 = arith.constant 0 : i32
    return %arg0, %c0_i32 : i32, i32
  }
}

</mosaic_0001>

<bundles_post_ra>
// kernel: tpu_custom_call.1
= control target key start
LH: loop header
LB: loop body
LE: loop exit
PB: predicated region body
PF: predicated region fallthrough
CT: control target
= control target key end

     0   :  { %12 = vsyncpa [#allocation3], 0  ;;  %s597_s0 = inlined_call_operand.hbm [shape: f32[8,32], index: 0, kind: input, shape index: {}]   ;;  %s598_s1 = inlined_call_operand.vmem [shape: f32[32,64], index: 1, kind: input, shape index: {}]   ;;  %s599_s2 = inlined_call_operand.vmem [shape: f32[1,64], index: 2, kind: input, shape index: {}]   ;;  %s600_s3 = inlined_call_operand.vmem [shape: f32[64,64], index: 3, kind: input, shape index: {}]   ;;  %s601_s4 = inlined_call_operand.vmem [shape: f32[1,64], index: 4, kind: input, shape index: {}]   ;;  %s602_s5 = inlined_call_operand.vmem [shape: f32[64,32], index: 5, kind: input, shape index: {}]   ;;  %s603_s6 = inlined_call_operand.vmem [shape: f32[1,32], index: 6, kind: input, shape index: {}]   ;;  %s604_s7 = inlined_call_operand.hbm [shape: f32[8,32], index: 7, kind: output, shape index: {}]  }
   0x1   :  { %13 = vsyncpa [#allocation4], 0  ;;  %s448_s24 = smov [#allocation2]  }
   0x2   :  { %s20_s25 = sshll.u32 %s448_s24, 4  ;;  %s21_s25 = int_to_ptr.vmem [resolvable:$true] %s20_s25 }
   0x3   :  { %s412_s26 = scalar_lea.vmem %s21_s25, 128  ;;  %p417_p1 = scmp.lt.s32.totalorder %s21_s25, %s21_s25 }
   0x4   :  { %p413_p0 = scmp.ne.s32.totalorder %s21_s25, %s412_s26  ;;  %p418_p2 = scmp.lt.s32.totalorder %s412_s26, %s412_s26 }
   0x6   :  { %p419_p3 = por %p418_p2, %p417_p1 }
   0x8   :  { %p420_p4 = pnand %p419_p3, %p413_p0 }
   0xa   :  { %423 = shalt.err (!%p420_p4)
}
   0xb   :  { %23 = dma.hbm_to_vmem [thread:$0]  %s597_s0, 128, %s21_s25, [#allocation3]  }
   0xc   :  { %444 = dma.done.wait [#allocation3], 128  }
   0xd   :  { %445 = vsyncadd [#allocation3], 4294967168  ;;  %v449_v0 = vmov 0.0   ;;  %vm450_vm0 = vmmov 0   ;;  %v43_v1 = vld [vmem:[%s598_s1 + $0x18] sm:$0xff]  ;;  %v42_v2 = vld [vmem:[%s598_s1 + $0x10] sm:$0xff] }
   0xe   :  { %351 = vmatprep.subr.mxu0 %v449_v0  ;;  %359 = vmatprep.mubr.msk.f32.mxu0 %vm450_vm0, %v449_v0  ;;  %v134_v3 = vld [vmem:[%s600_s3 + $0x38] sm:$0xff]  ;;  %v41_v4 = vld [vmem:[%s598_s1 + $0x8] sm:$0xff]  ;;  %v133_v5 = vld [vmem:[%s600_s3 + $0x30] sm:$0xff]  ;;  %vm51_vm1 = vcmask 261120   ;;  %vm142_vm2 = vcmask 523264   ;;  %s451_s23 = smov [#allocation5]  }
   0xf   :  { %362 = vmatprep.subr.mxu1 %v449_v0  ;;  %378 = vmatprep.mubr.msk.f32.mxu1 %vm450_vm0, %v449_v0  ;;  %v132_v6 = vld [vmem:[%s600_s3 + $0x28] sm:$0xff]  ;;  %v40_v7 = vld [vmem:[%s598_s1] sm:$0xff]  ;;  %v130_v10 = vld [vmem:[%s600_s3 + $0x18] sm:$0xff]  ;;  %s313_s24 = sshll.u32 %s451_s23, 4  ;;  %s314_s24 = int_to_ptr.vmem [resolvable:$true] %s313_s24 }
  0x10   :  { %352 = vmatpush3.msra.mxu0 %v43_v1  ;;  %363 = vmatpush3.msra.mxu1 %v134_v3  ;;  %v39_v8 = vld [vmem:[#allocation2] sm:$0xff]  ;;  %v129_v11 = vld [vmem:[%s600_s3 + $0x10] sm:$0xff]  ;;  %v128_v12 = vld [vmem:[%s600_s3 + $0x8] sm:$0xff]  ;;  %p429_p6 = scmp.lt.s32.totalorder %s314_s24, %s314_s24 }
  0x11   :  { %353 = vmatprep.subr.mxu0 %v449_v0  ;;  %364 = vmatprep.subr.mxu1 %v449_v0  ;;  %v131_v9 = vld [vmem:[%s600_s3 + $0x20] sm:$0xff]  ;;  %v225_v14 = vld [vmem:[%s602_s5 + $0x38] sm:$0xff]  ;;  %v224_v15 = vld [vmem:[%s602_s5 + $0x30] sm:$0xff] }
  0x12   :  { %354 = vmatpush3.msra.mxu0 %v42_v2  ;;  %365 = vmatpush3.msra.mxu1 %v133_v5  ;;  %v127_v13 = vld [vmem:[%s600_s3] sm:$0xff]  ;;  %v223_v16 = vld [vmem:[%s602_s5 + $0x28] sm:$0xff]  ;;  %v221_v24 = vld [vmem:[%s602_s5 + $0x18] sm:$0xff] }
  0x13   :  { %355 = vmatprep.subr.mxu0 %v449_v0  ;;  %366 = vmatprep.subr.mxu1 %v449_v0  ;;  %v222_v17 = vld [vmem:[%s602_s5 + $0x20] sm:$0xff]  ;;  %v220_v25 = vld [vmem:[%s602_s5 + $0x10] sm:$0xff]  ;;  %v219_v26 = vld [vmem:[%s602_s5 + $0x8] sm:$0xff] }
  0x14   :  { %356 = vmatpush3.msra.mxu0 %v41_v4  ;;  %367 = vmatpush3.msra.mxu1 %v132_v6  ;;  %v322_v18 = vld [vmem:[%s599_s2] ss:$0 sm:$0xff] }
  0x15   :  { %357 = vmatprep.subr.mxu0 %v449_v0  ;;  %368 = vmatprep.subr.mxu1 %v449_v0  ;;  %v218_v27 = vld [vmem:[%s602_s5] sm:$0xff] }
  0x16   :  { %358 = vmatpush3.msra.mxu0 %v40_v7  ;;  %369 = vmatpush3.msra.mxu1 %v131_v9  ;;  %v324_v28 = vld [vmem:[%s601_s4] ss:$0 sm:$0xff]  ;;  %s424_s4 = scalar_lea.vmem %s314_s24, 128 }
  0x17   :  { %360 = vmatmul.mubr.msk.f32.vlgmr.msra.gmra.mxu0 %vm51_vm1, %v39_v8  ;;  %370 = vmatprep.subr.mxu1 %v449_v0  ;;  %v326_v34 = vld [vmem:[%s603_s6] ss:$0 sm:$0xff]  ;;  %p425_p5 = scmp.ne.s32.totalorder %s314_s24, %s424_s4  ;;  %p430_p7 = scmp.lt.s32.totalorder %s424_s4, %s424_s4 }
  0x18   :  { %381 = vmatprep.subr.mxu0 %v449_v0  ;;  %397 = vmatprep.mubr.msk.f32.mxu0 %vm450_vm0, %v449_v0 }
  0x19   :  { %371 = vmatpush3.msra.mxu1 %v130_v10  ;;  %382 = vmatpush3.msra.mxu0 %v225_v14  ;;  %p431_p8 = por %p430_p7, %p429_p6 }
  0x1a   :  { %372 = vmatprep.subr.mxu1 %v449_v0  ;;  %383 = vmatprep.subr.mxu0 %v449_v0 }
  0x1b   :  { %373 = vmatpush3.msra.mxu1 %v129_v11  ;;  %384 = vmatpush3.msra.mxu0 %v224_v15  ;;  %p432_p9 = pnand %p431_p8, %p425_p5 }
  0x1c   :  { %374 = vmatprep.subr.mxu1 %v449_v0  ;;  %385 = vmatprep.subr.mxu0 %v449_v0 }
  0x1d   :  { %375 = vmatpush3.msra.mxu1 %v128_v12  ;;  %386 = vmatpush3.msra.mxu0 %v223_v16 }
  0x1e   :  { %376 = vmatprep.subr.mxu1 %v449_v0  ;;  %387 = vmatprep.subr.mxu0 %v449_v0 }
  0x1f   :  { %377 = vmatpush3.msra.mxu1 %v127_v13  ;;  %388 = vmatpush3.msra.mxu0 %v222_v17 }
  0x20   :  { %389 = vmatprep.subr.mxu0 %v449_v0 }
  0x21   :  { %390 = vmatpush3.msra.mxu0 %v221_v24 }
  0x22   :  { %391 = vmatprep.subr.mxu0 %v449_v0 }
  0x23   :  { %392 = vmatpush3.msra.mxu0 %v220_v25 }
  0x24   :  { %393 = vmatprep.subr.mxu0 %v449_v0 }
  0x25   :  { %394 = vmatpush3.msra.mxu0 %v219_v26 }
  0x26   :  { %395 = vmatprep.subr.mxu0 %v449_v0 }
  0x27   :  { %396 = vmatpush3.msra.mxu0 %v218_v27 }
  0xd7   :  { %v121_v19 = vpop.f32.mrf.mxu0 }
  0xd8   :  { %v122_v20 = vadd.f32 %v322_v18, %v121_v19 }
  0xd9   :  { %v361_v21 = vpop.f32.mrf.mxu0 }
  0xda   :  { %v125_v22 = vmul.f32 0.2, %v122_v20 }
  0xdc   :  { %v126_v23 = vmax.f32 %v122_v20, %v125_v22 }
  0xde   :  { %379 = vmatmul.mubr.msk.f32.vlgmr.msra.gmra.mxu1 %vm142_vm2, %v126_v23 }
 0x19e   :  { %v212_v29 = vpop.f32.mrf.mxu1 }
 0x19f   :  { %v213_v30 = vadd.f32 %v324_v28, %v212_v29 }
 0x1a0   :  { %v380_v31 = vpop.f32.mrf.mxu1 }
 0x1a1   :  { %v216_v32 = vmul.f32 0.2, %v213_v30 }
 0x1a3   :  { %v217_v33 = vmax.f32 %v213_v30, %v216_v32 }
 0x1a5   :  { %398 = vmatmul.mubr.msk.f32.vlgmr.msra.gmra.mxu0 %vm142_vm2, %v217_v33 }
 0x265   :  { %v302_v35 = vpop.f32.mrf.mxu0 }
 0x266   :  { %v303_v36 = vadd.f32 %v326_v34, %v302_v35 }
 0x267   :  { %v399_v37 = vpop.f32.mrf.mxu0 }
 0x268   :  { %306 = vst.msk [vmem:[#allocation5] sm:$0xff] %vm51_vm1, %v303_v36 }
 0x269   :  { %435 = shalt.err (!%p432_p9)
}
 0x26a   :  { %316 = dma.vmem_to_hbm [thread:$0]  %s314_s24, 128, %s604_s7, [#allocation4]  }
 0x26b   :  { %446 = dma.done.wait [#allocation4], 128  }
 0x26c   :  { %447 = vsyncadd [#allocation4], 4294967168 }
 0x26d   :  { %320 = vsyncpa [#allocation3], 1 }
 0x26e   :  { %321 = vsyncpa [#allocation4], 1 }

</bundles_post_ra>
